<compile_context>
chip_gen: v7x
topology: tpu7x:2x2x1
jax: 0.10.0
libtpu: 0.0.40
codegen_flags: <defaults>
</compile_context>

<pallas_src>
import math

import jax
import jax.numpy as jnp
from jax.experimental import pallas as pl
from jax.experimental.pallas import tpu as pltpu

_LANES = 128
_MIB = 1024 * 1024


def _drop_path_kernel(x_ref, s_ref, o_ref):
    # x_ref / o_ref: (TS, 128) tile of the batch-fused feature slab.
    # s_ref: (TS, 1) f32 per-row scale (0.0 if the row's sample is dropped,
    # 1/keep_prob if kept). Single VPU multiply per element; HBM-bound.
    o_ref[...] = (x_ref[...] * s_ref[...]).astype(o_ref.dtype)


def _target_block_bytes():
    # Generation-aware block sizing (per-step overhead vs. HBM bandwidth):
    #   v5e (~0.8 TB/s): 2 MiB step is ~5 us, overhead already <8%.
    #   v6e (~1.4 TB/s): 4 MiB halves step overhead, trivial for 128 MiB VMEM.
    #   v7x (~3.2 TB/s): 8 MiB keeps overhead low; 4x8 MiB double-buffered
    #                    traffic still fits the 64 MiB physical VMEM.
    try:
        kind = jax.devices()[0].device_kind.lower()
    except Exception:
        kind = ""
    if "v5" in kind:
        return 2 * _MIB
    if "v7" in kind:
        return 8 * _MIB
    return 4 * _MIB  # v6e and unknown generations


def van_drop_path(x, drop_prob, key, training=True, *, block_rows=None):
    """JAX/Pallas equivalent of transformers' VanDropPath.forward."""
    if drop_prob == 0.0 or not training:
        return x
    if drop_prob >= 1.0:
        # The torch reference divides by keep_prob == 0 and emits NaN/inf;
        # reject explicitly instead of silently producing NaNs.
        raise ValueError("drop_prob must be in [0, 1) for a finite result.")

    keep_prob = 1.0 - drop_prob
    orig_shape = x.shape
    batch = orig_shape[0]
    n = math.prod(orig_shape[1:])

    # Per-sample keep decision drawn in f32 (matches HF drop_path numerics);
    # fold 1/keep_prob into the mask so the kernel does a single multiply.
    u = jax.random.uniform(key, (batch,), dtype=jnp.float32)
    scale = jnp.floor(jnp.float32(keep_prob) + u) / jnp.float32(keep_prob)  # {0, 1/keep_prob}

    if n % _LANES != 0:
        # Ragged feature count: pad + kernel + slice would be ~3 HBM passes;
        # a fused XLA broadcast-multiply is a single memory-bound pass.
        y = x.reshape(batch, n) * scale[:, None]
        return y.astype(x.dtype).reshape(orig_shape)

    itemsize = jnp.dtype(x.dtype).itemsize
    rows_per_sample = n // _LANES
    total_rows = batch * rows_per_sample

    if block_rows is None:
        # TS a multiple of 32 satisfies the sublane constraint for f32/bf16/int8.
        ts = max(32, (_target_block_bytes() // (_LANES * itemsize)) // 32 * 32)
    else:
        ts = block_rows
    ts = min(ts, total_rows)  # block == full array dims is always legal

    x2 = x.reshape(total_rows, _LANES)
    # Per-row scale (4 B/row extra traffic) so blocks may straddle sample
    # boundaries; block size is decoupled from per-sample size.
    scale_rows = jnp.broadcast_to(
        scale[:, None], (batch, rows_per_sample)
    ).reshape(total_rows, 1)

    block_bytes = ts * _LANES * itemsize
    vmem_limit = int(min(max(32 * _MIB, 4 * block_bytes + 8 * _MIB), 48 * _MIB))

    out = pl.pallas_call(
        _drop_path_kernel,
        out_shape=jax.ShapeDtypeStruct((total_rows, _LANES), x.dtype),
        grid=(pl.cdiv(total_rows, ts),),  # partial last block handled by masking
        in_specs=[
            pl.BlockSpec((ts, _LANES), lambda j: (j, 0)),
            pl.BlockSpec((ts, 1), lambda j: (j, 0)),
        ],
        out_specs=pl.BlockSpec((ts, _LANES), lambda j: (j, 0)),
        input_output_aliases={0: 0},
        compiler_params=pltpu.CompilerParams(
            dimension_semantics=("parallel",),
            vmem_limit_bytes=vmem_limit,
        ),
    )(x2, scale_rows)

    return out.reshape(orig_shape)


if __name__ == "__main__":
    key = jax.random.PRNGKey(0)
    k_x, k_mask, k_x2, k_x3 = jax.random.split(key, 4)

    drop_prob = 0.5
    keep_prob = 1.0 - drop_prob

    def ref_drop_path(x, key):
        u = jax.random.uniform(key, (x.shape[0],), dtype=jnp.float32)
        mask = jnp.floor(keep_prob + u).reshape((x.shape[0],) + (1,) * (x.ndim - 1))
        return (x / keep_prob * mask).astype(x.dtype)

    # --- Case 1: 128-aligned features (4*16*16 = 1024) — Pallas path.
    x = jax.random.normal(k_x, (2, 4, 16, 16), dtype=jnp.float32)
    y = jax.block_until_ready(van_drop_path(x, drop_prob, k_mask, training=True))
    assert jnp.allclose(y, ref_drop_path(x, k_mask), atol=1e-6, rtol=1e-5)

    # Eval mode and drop_prob == 0 are identities.
    assert jnp.array_equal(van_drop_path(x, drop_prob, k_mask, training=False), x)
    assert jnp.array_equal(van_drop_path(x, 0.0, k_mask, training=True), x)

    # --- Case 2: 128-aligned but rows (24) not a multiple of the block (16)
    #             — exercises the masked partial last block.
    x_pb = jax.random.normal(k_x2, (2, 4, 16, 24), dtype=jnp.float32)
    y_pb = jax.block_until_ready(
        van_drop_path(x_pb, drop_prob, k_mask, training=True, block_rows=16)
    )
    assert jnp.allclose(y_pb, ref_drop_path(x_pb, k_mask), atol=1e-6, rtol=1e-5)

    # --- Case 3: ragged feature count (3*7*5 = 105) — fused XLA fallback path.
    x_odd = jax.random.normal(k_x3, (2, 3, 7, 5), dtype=jnp.float32)
    y_odd = jax.block_until_ready(van_drop_path(x_odd, drop_prob, k_mask, training=True))
    assert jnp.allclose(y_odd, ref_drop_path(x_odd, k_mask), atol=1e-6, rtol=1e-5)

    print("KERNEL_OK")
</pallas_src>

<mosaic_0001>
module attributes {stable_mosaic.version = 11 : i64} {
  func.func @_drop_path_kernel(%arg0: i32, %arg1: memref<16x128xf32, #tpu.memory_space<vmem>>, %arg2: memref<16x1xf32, #tpu.memory_space<vmem>>, %arg3: memref<16x128xf32, #tpu.memory_space<vmem>>) attributes {dimension_semantics = [#tpu.dimension_semantics<parallel>], iteration_bounds = array<i64: 1>, scalar_prefetch = 0 : i64, scratch_operands = 0 : i64, tpu.core_type = #tpu.core_type<tc>, window_params = [{transform_indices = @transform_0, window_bounds = array<i64: 16, 128>}, {transform_indices = @transform_1, window_bounds = array<i64: 16, 1>}, {transform_indices = @transform_2, window_bounds = array<i64: 16, 128>}]} {
    %c0 = arith.constant 0 : index
    %c0_0 = arith.constant 0 : index
    %0 = vector.load %arg1[%c0, %c0_0] : memref<16x128xf32, #tpu.memory_space<vmem>>, vector<16x128xf32>
    %c0_1 = arith.constant 0 : index
    %c0_2 = arith.constant 0 : index
    %1 = vector.load %arg2[%c0_1, %c0_2] : memref<16x1xf32, #tpu.memory_space<vmem>>, vector<16x1xf32>
    %2 = vector.broadcast %1 : vector<16x1xf32> to vector<16x128xf32>
    %3 = arith.mulf %0, %2 : vector<16x128xf32>
    %c0_3 = arith.constant 0 : index
    %c0_4 = arith.constant 0 : index
    %4 = vector.load %arg3[%c0_3, %c0_4] : memref<16x128xf32, #tpu.memory_space<vmem>>, vector<16x128xf32>
    tpu.vector_store %arg3[%c0_3, %c0_4], %3 {strides = array<i32>} : memref<16x128xf32, #tpu.memory_space<vmem>>, vector<16x128xf32>,
    return
  }
  func.func @transform_0(%arg0: i32) -> (i32, i32) {
    %c0_i32 = arith.constant 0 : i32
    %c0_i32_0 = arith.constant 0 : i32
    return %arg0, %c0_i32 : i32, i32
  }
  func.func @transform_1(%arg0: i32) -> (i32, i32) {
    %c0_i32 = arith.constant 0 : i32
    %c0_i32_0 = arith.constant 0 : i32
    return %arg0, %c0_i32 : i32, i32
  }
  func.func @transform_2(%arg0: i32) -> (i32, i32) {
    %c0_i32 = arith.constant 0 : i32
    %c0_i32_0 = arith.constant 0 : i32
    return %arg0, %c0_i32 : i32, i32
  }
}

</mosaic_0001>

<bundles_post_ra>
// kernel: tpu_custom_call.1
= control target key start
LH: loop header
LB: loop body
LE: loop exit
PB: predicated region body
PF: predicated region fallthrough
CT: control target
= control target key end

     0   :  { %7 = vsyncpa [#allocation3], 0  ;;  %s171_s0 = inlined_call_operand.hbm [shape: f32[16,128], index: 0, kind: input, shape index: {}, may-alias: {0,2}]   ;;  %s172_s1 = inlined_call_operand.vmem [shape: f32[16,1], index: 1, kind: input, shape index: {}]   ;;  %s173_s2 = inlined_call_operand.hbm [shape: f32[16,128], index: 2, kind: output, shape index: {}, may-alias: {0,2}]  }
   0x1   :  { %8 = vsyncpa [#allocation4], 0  ;;  %s115_s9 = smov [#allocation2]   ;;  %s67_s13 = scalar_lea.hbm %s171_s0, 256 }
   0x2   :  { %s14_s10 = sshll.u32 %s115_s9, 4  ;;  %p68_p0 = scmp.ne.s32.totalorder %s171_s0, %s67_s13  ;;  %s15_s10 = int_to_ptr.vmem [resolvable:$true] %s14_s10 }
   0x3   :  { %p71_p1 = scmp.lt.u32.totalorder %s67_s13, %s171_s0 }
   0x5   :  { %p73_p2 = pnand %p71_p1, %p68_p0 }
   0x7   :  { %76 = shalt.err (!%p73_p2)
}
   0x8   :  { %s77_s18 = scalar_lea.vmem %s15_s10, 256  ;;  %p82_p4 = scmp.lt.s32.totalorder %s15_s10, %s15_s10 }
   0x9   :  { %p78_p3 = scmp.ne.s32.totalorder %s15_s10, %s77_s18  ;;  %p83_p5 = scmp.lt.s32.totalorder %s77_s18, %s77_s18 }
   0xb   :  { %p84_p6 = por %p83_p5, %p82_p4 }
   0xd   :  { %p85_p7 = pnand %p84_p6, %p78_p3 }
   0xf   :  { %88 = shalt.err (!%p85_p7)
}
  0x10   :  { %s116_s19 = smov 128   ;;  %s117_s20 = smov 8  }
  0x11   :  { %20 = dma.hbm_to_vmem [thread:$0]  %s171_s0, 256, %s15_s10, [#allocation3], %s116_s19, %s116_s19, %s117_s20  }
  0x12   :  { %111 = dma.done.wait [#allocation3], 256  }
  0x13   :  { %112 = vsyncadd [#allocation3], 4294967040  ;;  %v118_v0 = vmov 0   ;;  %v28_v1 = vld [vmem:[%s172_s1] sm:$0xff]  ;;  %v29_v2 = vld [vmem:[%s172_s1 + $0x8] sm:$0xff]  ;;  %s119_s27 = smov [#allocation5]  }
  0x14   :  { %66 = vset.pattern.permute.xlu0 %v118_v0  ;;  %v26_v3 = vld [vmem:[#allocation2] sm:$0xff]  ;;  %v27_v6 = vld [vmem:[#allocation2 + $0x8] sm:$0xff]  ;;  %s49_s0 = sshll.u32 %s119_s27, 4  ;;  %s50_s0 = int_to_ptr.vmem [resolvable:$true] %s49_s0 }
  0x15   :  { %32 = vperm.xlu0 %66, %v28_v1   ;;  %s89_s28 = scalar_lea.vmem %s50_s0, 256  ;;  %p94_p9 = scmp.lt.s32.totalorder %s50_s0, %s50_s0 }
  0x16   :  { %p90_p8 = scmp.ne.s32.totalorder %s50_s0, %s89_s28  ;;  %p95_p10 = scmp.lt.s32.totalorder %s89_s28, %s89_s28 }
  0x18   :  { %p96_p11 = por %p95_p10, %p94_p9 }
  0x19   :  { %37 = vperm.xlu0 %66, %v29_v2  }
  0x1a   :  { %p97_p12 = pnand %p96_p11, %p90_p8 }
  0x94   :  { %v33_v4 = vpop.permute.xlu0 %32 }
  0x95   :  { %v40_v5 = vmul.f32 %v33_v4, %v26_v3 }
  0x97   :  { %42 = vst [vmem:[#allocation5] sm:$0xff] %v40_v5 }
  0x98   :  { %v38_v7 = vpop.permute.xlu0 %37 }
  0x99   :  { %v41_v8 = vmul.f32 %v38_v7, %v27_v6 }
  0x9b   :  { %43 = vst [vmem:[#allocation5 + $0x8] sm:$0xff] %v41_v8 }
  0x9c   :  { %100 = shalt.err (!%p97_p12)
}
  0x9d   :  { %s101_s30 = scalar_lea.hbm %s173_s2, 256 }
  0x9e   :  { %p102_p13 = scmp.ne.s32.totalorder %s173_s2, %s101_s30  ;;  %p105_p0 = scmp.lt.u32.totalorder %s101_s30, %s173_s2 }
  0xa0   :  { %p107_p1 = pnand %p105_p0, %p102_p13 }
  0xa2   :  { %110 = shalt.err (!%p107_p1)
}
  0xa3   :  { %55 = dma.vmem_to_hbm [thread:$0]  %s50_s0, 256, %s173_s2, [#allocation4], %s116_s19, %s116_s19, %s117_s20  }
  0xa4   :  { %113 = dma.done.wait [#allocation4], 256  }
  0xa5   :  { %114 = vsyncadd [#allocation4], 4294967040 }
  0xa6   :  { %59 = vsyncpa [#allocation3], 1 }
  0xa7   :  { %60 = vsyncpa [#allocation4], 1 }

</bundles_post_ra>
